<compile_context>
chip_gen: v7x
topology: tpu7x:2x2x1
jax: 0.10.0
libtpu: 0.0.40
codegen_flags: <defaults>
</compile_context>

<pallas_src>
import math

import jax
import jax.numpy as jnp
from jax.experimental import pallas as pl
from jax.experimental.pallas import tpu as pltpu


def _round_up(x: int, m: int) -> int:
    return (x + m - 1) // m * m


# -----------------------------------------------------------------------------
# Compile-time depth-interpolation taps (PyTorch trilinear, align_corners=False,
# depth-only since H/W are unchanged).
# -----------------------------------------------------------------------------
def _interp_taps(maxdisp: int, d_in: int):
    scale = d_in / maxdisp
    taps = []
    for d in range(maxdisp):
        src = (d + 0.5) * scale - 0.5
        src = max(src, 0.0)                      # PyTorch clamps negative src to 0
        i0 = min(int(math.floor(src)), d_in - 1)
        i1 = min(i0 + 1, d_in - 1)
        w1 = float(src - i0)
        # Snap float artifacts (|err| <= 1e-6 in the weights, irrelevant vs the
        # true resample) so pure-copy taps cost 1 VPU op instead of 3.
        if w1 < 1e-6:
            w1 = 0.0
        elif w1 > 1.0 - 1e-6:
            w1 = 1.0
        w0 = 1.0 - w1
        taps.append((i0, i1, w0, w1))
    return taps


def _canon_tap(tap):
    i0, i1, w0, w1 = tap
    if i0 == i1:
        return (i0, i0, w0 + w1, 0.0)
    if w1 == 0.0:
        return (i0, i0, w0, 0.0)
    if w0 == 0.0:
        return (i1, i1, w1, 0.0)
    return tap


def _tap_groups(maxdisp: int, d_in: int):
    """Group disparities whose interpolated rows are identical.

    Returns a list of (i0, i1, w0, w1, count, sum_d): each group needs one row
    computation and one exp; `count` weights the softmin denominator and
    `sum_d` the disparity-regression numerator.
    """
    acc = {}
    for d, tap in enumerate(_interp_taps(maxdisp, d_in)):
        key = _canon_tap(tap)
        cnt, sd = acc.get(key, (0, 0))
        acc[key] = (cnt + 1, sd + d)
    return [(i0, i1, w0, w1, cnt, sd)
            for (i0, i1, w0, w1), (cnt, sd) in acc.items()]


def _build_interp_matrix(maxdisp: int, d_in: int) -> jnp.ndarray:
    """Dense [maxdisp, D] interpolation matrix (pure-JAX reference only)."""
    m = [[0.0] * d_in for _ in range(maxdisp)]
    for d, (i0, i1, w0, w1) in enumerate(_interp_taps(maxdisp, d_in)):
        m[d][i0] += w0
        m[d][i1] += w1
    return jnp.array(m, dtype=jnp.float32)


# -----------------------------------------------------------------------------
# Kernel
# -----------------------------------------------------------------------------
def _make_disp_kernel(groups):
    """Unrolled VPU interpolation + two-pass softmin + disparity regression.

    Block shapes: x_ref (1, D, R, 128), o_ref (1, R, 128).  All work is on
    dense (R, 128) f32 tiles; the Softmin negation is folded into the tap
    weights.  Live state ~= D depth slabs + mx + denom + num.
    """
    depth_ids = sorted({g[0] for g in groups} | {g[1] for g in groups if g[3] != 0.0})

    def kernel(x_ref, o_ref):
        # Upcast each used depth slab once (input may be bf16); (R, 128) f32.
        slabs = {i: x_ref[0, i].astype(jnp.float32) for i in depth_ids}

        def neg_row(g):
            i0, i1, w0, w1, _, _ = g
            r = (-w0) * slabs[i0]
            if w1 != 0.0:
                r = r - w1 * slabs[i1]
            return r

        # Pass 1: running max of the negated interpolated rows (softmin shift).
        mx = neg_row(groups[0])
        for g in groups[1:]:
            mx = jnp.maximum(mx, neg_row(g))

        # Pass 2: denom = sum(e), num = sum(d * e); rows recomputed (2 cheap
        # VPU ops each) so only ~(D + 4) full-tile arrays stay live.
        denom = None
        num = None
        for g in groups:
            cnt, sd = g[4], g[5]
            e = jnp.exp(neg_row(g) - mx)
            de = e if cnt == 1 else float(cnt) * e
            denom = de if denom is None else denom + de
            if sd:
                ne = e if sd == 1 else float(sd) * e
                num = ne if num is None else num + ne
        if num is None:                       # maxdisp == 1 degenerate case
            num = jnp.zeros_like(denom)

        # One exact divide per output element (exp dominates; keeps parity
        # with the softmax reference).
        o_ref[0] = (num / denom).astype(o_ref.dtype)

    return kernel


# -----------------------------------------------------------------------------
# Wrapper
# -----------------------------------------------------------------------------
def _row_tiling(rows: int, batch: int, target_rows: int, min_steps: int = 4):
    """Pick (rows_per_tile, num_tiles, rows_padded)."""
    if rows <= target_rows:
        n_tiles, r = 1, rows
    else:
        n_tiles = -(-rows // target_rows)
        r = _round_up(-(-rows // n_tiles), 8)
    # Keep the grid at >= min_steps steps (v7x has 2 TensorCores; also keeps
    # the pipeline warm) as long as tiles stay reasonably sized.
    while batch * n_tiles < min_steps and r >= 16:
        n_tiles *= 2
        r = _round_up(-(-rows // n_tiles), 8)
    return r, n_tiles, r * n_tiles


def disp_forward(x: jnp.ndarray, maxdisp: int = 12, *,
                 target_rows: int | None = None) -> jnp.ndarray:
    """x: [B, 1, D, H, W] -> [B, H, W] float32 (matches Disp.forward).

    Pass x in bfloat16 (cast at the cost-volume producer) to halve HBM traffic
    of this bandwidth-bound kernel; in-kernel math is always float32.
    """
    B, C, D, H, W = x.shape
    assert C == 1, "Disp expects a single-channel cost volume"
    assert maxdisp >= 1 and D >= 1
    hw = H * W
    itemsize = jnp.dtype(x.dtype).itemsize

    rows = -(-hw // 128)
    if target_rows is None:
        # ~2-4 MiB of input per grid step (amortizes the ~0.35 us step cost).
        bytes_per_row = D * 128 * itemsize
        target_rows = max(64, min(2048, _round_up((4 << 20) // bytes_per_row, 8)))
    r_tile, n_tiles, rows_pad = _row_tiling(rows, B, target_rows)
    hw_pad = rows_pad * 128

    # Lane/sublane-dense layout: [B, D, rows_pad, 128].  Zero padding is safe:
    # padded lanes produce finite values (denom >= maxdisp) and are sliced off.
    x3 = x.reshape(B, D, hw)
    if hw_pad != hw:
        x3 = jnp.pad(x3, ((0, 0), (0, 0), (0, hw_pad - hw)))
    x4 = x3.reshape(B, D, rows_pad, 128)

    # Explicit VMEM budget from real padded tile sizes, capped below physical.
    tile_elems = r_tile * 128
    need = (2 * D * tile_elems * itemsize        # double-buffered input
            + 2 * tile_elems * 4                 # double-buffered output
            + (D + 12) * tile_elems * 4          # live f32 intermediates
            + (4 << 20))                         # compiler headroom
    try:
        cap = int(pltpu.get_tpu_info().vmem_capacity_bytes) * 3 // 4
    except Exception:                            # no TPU info (e.g. interpret)
        cap = 48 << 20                           # safe for v7x's 64 MiB VMEM
    vmem_bytes = int(min(cap, max(need, 32 << 20)))

    out = pl.pallas_call(
        _make_disp_kernel(_tap_groups(maxdisp, D)),
        out_shape=jax.ShapeDtypeStruct((B, rows_pad, 128), jnp.float32),
        grid_spec=pltpu.PrefetchScalarGridSpec(
            num_scalar_prefetch=0,
            grid=(B, n_tiles),
            in_specs=[pl.BlockSpec((1, D, r_tile, 128),
                                   lambda b, t: (b, 0, t, 0))],
            out_specs=pl.BlockSpec((1, r_tile, 128),
                                   lambda b, t: (b, t, 0)),
        ),
        compiler_params=pltpu.CompilerParams(
            dimension_semantics=("parallel", "parallel"),
            vmem_limit_bytes=vmem_bytes,
        ),
    )(x4)

    out = out.reshape(B, hw_pad)[:, :hw]
    return out.reshape(B, H, W)


# -----------------------------------------------------------------------------
# Pure-JAX reference (mirrors Disp.forward) for validation
# -----------------------------------------------------------------------------
def _reference(x: jnp.ndarray, maxdisp: int = 12) -> jnp.ndarray:
    B, C, D, H, W = x.shape
    m = _build_interp_matrix(maxdisp, D)                          # (maxdisp, D)
    interp = jnp.einsum("md,bdhw->bmhw", m, x[:, 0].astype(jnp.float32))
    p = jax.nn.softmax(-interp, axis=1)                           # Softmin(dim=1)
    disp = jnp.arange(maxdisp, dtype=jnp.float32).reshape(1, maxdisp, 1, 1)
    return jnp.sum(p * disp, axis=1)                              # (B, H, W)


if __name__ == "__main__":
    key = jax.random.PRNGKey(0)
    B, C, D, H, W = 2, 1, 4, 16, 16
    maxdisp = 12
    x = jax.random.normal(key, (B, C, D, H, W), dtype=jnp.float32)

    out = jax.block_until_ready(disp_forward(x, maxdisp=maxdisp))
    ref = jax.block_until_ready(_reference(x, maxdisp=maxdisp))
    assert out.shape == (B, H, W)
    err = float(jnp.max(jnp.abs(out - ref)))
    assert err < 1e-4, f"f32 mismatch vs pure-JAX reference: {err}"

    # bf16 cost-volume path (halves HBM reads; load-precision only, math is f32).
    out_bf16 = jax.block_until_ready(
        disp_forward(x.astype(jnp.bfloat16), maxdisp=maxdisp))
    err_bf16 = float(jnp.max(jnp.abs(out_bf16 - ref)))
    assert err_bf16 < 1e-1, f"bf16 mismatch vs pure-JAX reference: {err_bf16}"

    print("KERNEL_OK")
</pallas_src>

<mosaic_0001>
module attributes {stable_mosaic.version = 11 : i64} {
  func.func @kernel(%arg0: i32, %arg1: i32, %arg2: memref<1x4x2x128xf32, #tpu.memory_space<vmem>>, %arg3: memref<1x2x128xf32, #tpu.memory_space<vmem>>) attributes {dimension_semantics = [#tpu.dimension_semantics<parallel>, #tpu.dimension_semantics<parallel>], iteration_bounds = array<i64: 2, 1>, scalar_prefetch = 0 : i64, scratch_operands = 0 : i64, tpu.core_type = #tpu.core_type<tc>, window_params = [{transform_indices = @transform_0, window_bounds = array<i64: 1, 4, 2, 128>}, {transform_indices = @transform_1, window_bounds = array<i64: 1, 2, 128>}]} {
    %c0 = arith.constant 0 : index
    %c0_0 = arith.constant 0 : index
    %c0_1 = arith.constant 0 : index
    %c0_2 = arith.constant 0 : index
    %0 = vector.load %arg2[%c0, %c0_0, %c0_1, %c0_2] : memref<1x4x2x128xf32, #tpu.memory_space<vmem>>, vector<1x1x2x128xf32>
    %1 = vector.shape_cast %0 : vector<1x1x2x128xf32> to vector<2x128xf32>
    %c0_3 = arith.constant 0 : index
    %c1 = arith.constant 1 : index
    %c0_4 = arith.constant 0 : index
    %c0_5 = arith.constant 0 : index
    %2 = vector.load %arg2[%c0_3, %c1, %c0_4, %c0_5] : memref<1x4x2x128xf32, #tpu.memory_space<vmem>>, vector<1x1x2x128xf32>
    %3 = vector.shape_cast %2 : vector<1x1x2x128xf32> to vector<2x128xf32>
    %c0_6 = arith.constant 0 : index
    %c2 = arith.constant 2 : index
    %c0_7 = arith.constant 0 : index
    %c0_8 = arith.constant 0 : index
    %4 = vector.load %arg2[%c0_6, %c2, %c0_7, %c0_8] : memref<1x4x2x128xf32, #tpu.memory_space<vmem>>, vector<1x1x2x128xf32>
    %5 = vector.shape_cast %4 : vector<1x1x2x128xf32> to vector<2x128xf32>
    %c0_9 = arith.constant 0 : index
    %c3 = arith.constant 3 : index
    %c0_10 = arith.constant 0 : index
    %c0_11 = arith.constant 0 : index
    %6 = vector.load %arg2[%c0_9, %c3, %c0_10, %c0_11] : memref<1x4x2x128xf32, #tpu.memory_space<vmem>>, vector<1x1x2x128xf32>
    %7 = vector.shape_cast %6 : vector<1x1x2x128xf32> to vector<2x128xf32>
    %cst = arith.constant -1.000000e+00 : f32
    %8 = vector.broadcast %cst : f32 to vector<2x128xf32>
    %9 = arith.mulf %8, %1 : vector<2x128xf32>
    %cst_12 = arith.constant -0.666666686 : f32
    %10 = vector.broadcast %cst_12 : f32 to vector<2x128xf32>
    %11 = arith.mulf %10, %1 : vector<2x128xf32>
    %cst_13 = arith.constant 0.333333343 : f32
    %12 = vector.broadcast %cst_13 : f32 to vector<2x128xf32>
    %13 = arith.mulf %12, %3 : vector<2x128xf32>
    %14 = arith.subf %11, %13 : vector<2x128xf32>
    %15 = arith.maximumf %9, %14 : vector<2x128xf32>
    %cst_14 = arith.constant -0.333333343 : f32
    %16 = vector.broadcast %cst_14 : f32 to vector<2x128xf32>
    %17 = arith.mulf %16, %1 : vector<2x128xf32>
    %cst_15 = arith.constant 0.666666686 : f32
    %18 = vector.broadcast %cst_15 : f32 to vector<2x128xf32>
    %19 = arith.mulf %18, %3 : vector<2x128xf32>
    %20 = arith.subf %17, %19 : vector<2x128xf32>
    %21 = arith.maximumf %15, %20 : vector<2x128xf32>
    %cst_16 = arith.constant -1.000000e+00 : f32
    %22 = vector.broadcast %cst_16 : f32 to vector<2x128xf32>
    %23 = arith.mulf %22, %3 : vector<2x128xf32>
    %24 = arith.maximumf %21, %23 : vector<2x128xf32>
    %cst_17 = arith.constant -0.666666686 : f32
    %25 = vector.broadcast %cst_17 : f32 to vector<2x128xf32>
    %26 = arith.mulf %25, %3 : vector<2x128xf32>
    %cst_18 = arith.constant 0.333333343 : f32
    %27 = vector.broadcast %cst_18 : f32 to vector<2x128xf32>
    %28 = arith.mulf %27, %5 : vector<2x128xf32>
    %29 = arith.subf %26, %28 : vector<2x128xf32>
    %30 = arith.maximumf %24, %29 : vector<2x128xf32>
    %cst_19 = arith.constant -0.333333343 : f32
    %31 = vector.broadcast %cst_19 : f32 to vector<2x128xf32>
    %32 = arith.mulf %31, %3 : vector<2x128xf32>
    %cst_20 = arith.constant 0.666666686 : f32
    %33 = vector.broadcast %cst_20 : f32 to vector<2x128xf32>
    %34 = arith.mulf %33, %5 : vector<2x128xf32>
    %35 = arith.subf %32, %34 : vector<2x128xf32>
    %36 = arith.maximumf %30, %35 : vector<2x128xf32>
    %cst_21 = arith.constant -1.000000e+00 : f32
    %37 = vector.broadcast %cst_21 : f32 to vector<2x128xf32>
    %38 = arith.mulf %37, %5 : vector<2x128xf32>
    %39 = arith.maximumf %36, %38 : vector<2x128xf32>
    %cst_22 = arith.constant -0.666666686 : f32
    %40 = vector.broadcast %cst_22 : f32 to vector<2x128xf32>
    %41 = arith.mulf %40, %5 : vector<2x128xf32>
    %cst_23 = arith.constant 0.333333343 : f32
    %42 = vector.broadcast %cst_23 : f32 to vector<2x128xf32>
    %43 = arith.mulf %42, %7 : vector<2x128xf32>
    %44 = arith.subf %41, %43 : vector<2x128xf32>
    %45 = arith.maximumf %39, %44 : vector<2x128xf32>
    %cst_24 = arith.constant -0.333333343 : f32
    %46 = vector.broadcast %cst_24 : f32 to vector<2x128xf32>
    %47 = arith.mulf %46, %5 : vector<2x128xf32>
    %cst_25 = arith.constant 0.666666686 : f32
    %48 = vector.broadcast %cst_25 : f32 to vector<2x128xf32>
    %49 = arith.mulf %48, %7 : vector<2x128xf32>
    %50 = arith.subf %47, %49 : vector<2x128xf32>
    %51 = arith.maximumf %45, %50 : vector<2x128xf32>
    %cst_26 = arith.constant -1.000000e+00 : f32
    %52 = vector.broadcast %cst_26 : f32 to vector<2x128xf32>
    %53 = arith.mulf %52, %7 : vector<2x128xf32>
    %54 = arith.maximumf %51, %53 : vector<2x128xf32>
    %cst_27 = arith.constant -1.000000e+00 : f32
    %55 = vector.broadcast %cst_27 : f32 to vector<2x128xf32>
    %56 = arith.mulf %55, %1 : vector<2x128xf32>
    %57 = arith.subf %56, %54 : vector<2x128xf32>
    %58 = math.exp %57 : vector<2x128xf32>
    %cst_28 = arith.constant 2.000000e+00 : f32
    %59 = vector.broadcast %cst_28 : f32 to vector<2x128xf32>
    %60 = arith.mulf %59, %58 : vector<2x128xf32>
    %cst_29 = arith.constant -0.666666686 : f32
    %61 = vector.broadcast %cst_29 : f32 to vector<2x128xf32>
    %62 = arith.mulf %61, %1 : vector<2x128xf32>
    %cst_30 = arith.constant 0.333333343 : f32
    %63 = vector.broadcast %cst_30 : f32 to vector<2x128xf32>
    %64 = arith.mulf %63, %3 : vector<2x128xf32>
    %65 = arith.subf %62, %64 : vector<2x128xf32>
    %66 = arith.subf %65, %54 : vector<2x128xf32>
    %67 = math.exp %66 : vector<2x128xf32>
    %68 = arith.addf %60, %67 : vector<2x128xf32>
    %cst_31 = arith.constant 2.000000e+00 : f32
    %69 = vector.broadcast %cst_31 : f32 to vector<2x128xf32>
    %70 = arith.mulf %69, %67 : vector<2x128xf32>
    %71 = arith.addf %58, %70 : vector<2x128xf32>
    %cst_32 = arith.constant -0.333333343 : f32
    %72 = vector.broadcast %cst_32 : f32 to vector<2x128xf32>
    %73 = arith.mulf %72, %1 : vector<2x128xf32>
    %cst_33 = arith.constant 0.666666686 : f32
    %74 = vector.broadcast %cst_33 : f32 to vector<2x128xf32>
    %75 = arith.mulf %74, %3 : vector<2x128xf32>
    %76 = arith.subf %73, %75 : vector<2x128xf32>
    %77 = arith.subf %76, %54 : vector<2x128xf32>
    %78 = math.exp %77 : vector<2x128xf32>
    %79 = arith.addf %68, %78 : vector<2x128xf32>
    %cst_34 = arith.constant 3.000000e+00 : f32
    %80 = vector.broadcast %cst_34 : f32 to vector<2x128xf32>
    %81 = arith.mulf %80, %78 : vector<2x128xf32>
    %82 = arith.addf %71, %81 : vector<2x128xf32>
    %cst_35 = arith.constant -1.000000e+00 : f32
    %83 = vector.broadcast %cst_35 : f32 to vector<2x128xf32>
    %84 = arith.mulf %83, %3 : vector<2x128xf32>
    %85 = arith.subf %84, %54 : vector<2x128xf32>
    %86 = math.exp %85 : vector<2x128xf32>
    %87 = arith.addf %79, %86 : vector<2x128xf32>
    %cst_36 = arith.constant 4.000000e+00 : f32
    %88 = vector.broadcast %cst_36 : f32 to vector<2x128xf32>
    %89 = arith.mulf %88, %86 : vector<2x128xf32>
    %90 = arith.addf %82, %89 : vector<2x128xf32>
    %cst_37 = arith.constant -0.666666686 : f32
    %91 = vector.broadcast %cst_37 : f32 to vector<2x128xf32>
    %92 = arith.mulf %91, %3 : vector<2x128xf32>
    %cst_38 = arith.constant 0.333333343 : f32
    %93 = vector.broadcast %cst_38 : f32 to vector<2x128xf32>
    %94 = arith.mulf %93, %5 : vector<2x128xf32>
    %95 = arith.subf %92, %94 : vector<2x128xf32>
    %96 = arith.subf %95, %54 : vector<2x128xf32>
    %97 = math.exp %96 : vector<2x128xf32>
    %98 = arith.addf %87, %97 : vector<2x128xf32>
    %cst_39 = arith.constant 5.000000e+00 : f32
    %99 = vector.broadcast %cst_39 : f32 to vector<2x128xf32>
    %100 = arith.mulf %99, %97 : vector<2x128xf32>
    %101 = arith.addf %90, %100 : vector<2x128xf32>
    %cst_40 = arith.constant -0.333333343 : f32
    %102 = vector.broadcast %cst_40 : f32 to vector<2x128xf32>
    %103 = arith.mulf %102, %3 : vector<2x128xf32>
    %cst_41 = arith.constant 0.666666686 : f32
    %104 = vector.broadcast %cst_41 : f32 to vector<2x128xf32>
    %105 = arith.mulf %104, %5 : vector<2x128xf32>
    %106 = arith.subf %103, %105 : vector<2x128xf32>
    %107 = arith.subf %106, %54 : vector<2x128xf32>
    %108 = math.exp %107 : vector<2x128xf32>
    %109 = arith.addf %98, %108 : vector<2x128xf32>
    %cst_42 = arith.constant 6.000000e+00 : f32
    %110 = vector.broadcast %cst_42 : f32 to vector<2x128xf32>
    %111 = arith.mulf %110, %108 : vector<2x128xf32>
    %112 = arith.addf %101, %111 : vector<2x128xf32>
    %cst_43 = arith.constant -1.000000e+00 : f32
    %113 = vector.broadcast %cst_43 : f32 to vector<2x128xf32>
    %114 = arith.mulf %113, %5 : vector<2x128xf32>
    %115 = arith.subf %114, %54 : vector<2x128xf32>
    %116 = math.exp %115 : vector<2x128xf32>
    %117 = arith.addf %109, %116 : vector<2x128xf32>
    %cst_44 = arith.constant 7.000000e+00 : f32
    %118 = vector.broadcast %cst_44 : f32 to vector<2x128xf32>
    %119 = arith.mulf %118, %116 : vector<2x128xf32>
    %120 = arith.addf %112, %119 : vector<2x128xf32>
    %cst_45 = arith.constant -0.666666686 : f32
    %121 = vector.broadcast %cst_45 : f32 to vector<2x128xf32>
    %122 = arith.mulf %121, %5 : vector<2x128xf32>
    %cst_46 = arith.constant 0.333333343 : f32
    %123 = vector.broadcast %cst_46 : f32 to vector<2x128xf32>
    %124 = arith.mulf %123, %7 : vector<2x128xf32>
    %125 = arith.subf %122, %124 : vector<2x128xf32>
    %126 = arith.subf %125, %54 : vector<2x128xf32>
    %127 = math.exp %126 : vector<2x128xf32>
    %128 = arith.addf %117, %127 : vector<2x128xf32>
    %cst_47 = arith.constant 8.000000e+00 : f32
    %129 = vector.broadcast %cst_47 : f32 to vector<2x128xf32>
    %130 = arith.mulf %129, %127 : vector<2x128xf32>
    %131 = arith.addf %120, %130 : vector<2x128xf32>
    %cst_48 = arith.constant -0.333333343 : f32
    %132 = vector.broadcast %cst_48 : f32 to vector<2x128xf32>
    %133 = arith.mulf %132, %5 : vector<2x128xf32>
    %cst_49 = arith.constant 0.666666686 : f32
    %134 = vector.broadcast %cst_49 : f32 to vector<2x128xf32>
    %135 = arith.mulf %134, %7 : vector<2x128xf32>
    %136 = arith.subf %133, %135 : vector<2x128xf32>
    %137 = arith.subf %136, %54 : vector<2x128xf32>
    %138 = math.exp %137 : vector<2x128xf32>
    %139 = arith.addf %128, %138 : vector<2x128xf32>
    %cst_50 = arith.constant 9.000000e+00 : f32
    %140 = vector.broadcast %cst_50 : f32 to vector<2x128xf32>
    %141 = arith.mulf %140, %138 : vector<2x128xf32>
    %142 = arith.addf %131, %141 : vector<2x128xf32>
    %cst_51 = arith.constant -1.000000e+00 : f32
    %143 = vector.broadcast %cst_51 : f32 to vector<2x128xf32>
    %144 = arith.mulf %143, %7 : vector<2x128xf32>
    %145 = arith.subf %144, %54 : vector<2x128xf32>
    %146 = math.exp %145 : vector<2x128xf32>
    %cst_52 = arith.constant 2.000000e+00 : f32
    %147 = vector.broadcast %cst_52 : f32 to vector<2x128xf32>
    %148 = arith.mulf %147, %146 : vector<2x128xf32>
    %149 = arith.addf %139, %148 : vector<2x128xf32>
    %cst_53 = arith.constant 2.100000e+01 : f32
    %150 = vector.broadcast %cst_53 : f32 to vector<2x128xf32>
    %151 = arith.mulf %150, %146 : vector<2x128xf32>
    %152 = arith.addf %142, %151 : vector<2x128xf32>
    %153 = arith.divf %152, %149 : vector<2x128xf32>
    %c0_54 = arith.constant 0 : index
    %c0_55 = arith.constant 0 : index
    %c0_56 = arith.constant 0 : index
    %154 = vector.load %arg3[%c0_54, %c0_55, %c0_56] : memref<1x2x128xf32, #tpu.memory_space<vmem>>, vector<1x2x128xf32>
    %155 = vector.shape_cast %154 : vector<1x2x128xf32> to vector<2x128xf32>
    %156 = vector.shape_cast %153 : vector<2x128xf32> to vector<1x2x128xf32>
    tpu.vector_store %arg3[%c0_54, %c0_55, %c0_56], %156 {strides = array<i32>} : memref<1x2x128xf32, #tpu.memory_space<vmem>>, vector<1x2x128xf32>,
    return
  }
  func.func @transform_0(%arg0: i32, %arg1: i32) -> (i32, i32, i32, i32) {
    %c0_i32 = arith.constant 0 : i32
    %c0_i32_0 = arith.constant 0 : i32
    %c0_i32_1 = arith.constant 0 : i32
    return %arg0, %c0_i32, %arg1, %c0_i32_0 : i32, i32, i32, i32
  }
  func.func @transform_1(%arg0: i32, %arg1: i32) -> (i32, i32, i32) {
    %c0_i32 = arith.constant 0 : i32
    %c0_i32_0 = arith.constant 0 : i32
    return %arg0, %arg1, %c0_i32 : i32, i32, i32
  }
}

</mosaic_0001>

<bundles_post_ra>
// kernel: tpu_custom_call.1
= control target key start
LH: loop header
LB: loop body
LE: loop exit
PB: predicated region body
PF: predicated region fallthrough
CT: control target
= control target key end

     0   :  { %6 = vsyncpa [#allocation3], 0  ;;  %s754_s0 = inlined_call_operand.hbm [shape: f32[2,4,2,128], index: 0, kind: input, shape index: {}]   ;;  %s755_s1 = inlined_call_operand.hbm [shape: f32[2,2,128], index: 1, kind: output, shape index: {}]  }
   0x1   :  { %8 = vsyncpa [#allocation3 + $0x1], 0 }
   0x2   :  { %9 = vsyncpa [#allocation4], 0 }
   0x3   :  { %11 = vsyncpa [#allocation4 + $0x1], 0  ;;  %s580_s6 = smov 0   ;;  %s582_s7 = smov 0  }
   0x4   :  { %s584_s8 = smov 0   ;;  %s586_s9 = smov 0  }
   0x5   :  { %s588_s10 = smov 0   ;;  %s590_s11 = smov 0  }
   0x6 LB: > { %s348_s12 = sadd.s32 4294967295, %s564_s11   ;;  %s349_s13 = sadd.s32 4294967294, %s564_s11   ;;  %s564_s11 = sphi %s590_s11, %s17_s11   ;;  %s560_s10 = sphi %s588_s10, %s770_s10   ;;  %s556_s9 = sphi %s586_s9, %s769_s9   ;;  %s552_s8 = sphi %s584_s8, %s768_s8   ;;  %s548_s7 = sphi %s582_s7, %s767_s7   ;;  %s544_s6 = sphi %s580_s6, %s766_s6  }
   0x7   : > { %s29_s14 = sadd.s32 1, %s560_s10  ;;  %s38_s15 = sadd.s32 1, %s552_s8 }
   0x8   : > { %p31_p0 = scmp.ge.s32.totalorder %s29_s14, 2  ;;  %p45_p1 = scmp.ne.s32.totalorder %s552_s8, %s548_s7 }
   0x9   : > { %p46_p2 = scmp.eq.s32.totalorder %s564_s11, 0  ;;  %p51_p3 = scmp.ne.s32.totalorder %s548_s7, %s544_s6 }
   0xa   : > { %s772_s14 = smov (%p31_p0, %s29_s14), 0  ;;  %p52_p5 = scmp.eq.s32.totalorder %s348_s12, 0 }
   0xb   : > { %p621_p4 = por %p46_p2, %p45_p1  ;;  %s33_s17 = ssub.s32 %s560_s10, %s772_s14 }
   0xc   : > { %p77_p6 = scmp.eq.s32.totalorder %s348_s12, 1  ;;  %p36_p7 = scmp.eq.s32.totalorder %s33_s17, 0 }
   0xd   : > { %p627_p8 = por %p52_p5, %p51_p3  ;;  %p83_p10 = scmp.eq.s32.totalorder %s349_s13, 1 }
   0xe   : > { %p631_p9 = por %p77_p6, %p45_p1  ;;  %p378_p13 = scmp.lt.s32.totalorder %s564_s11, 2 }
   0xf   : > { %s636_s20 = scalar_select %p36_p7, %s552_s8, %s38_s15  }
  0x10   : > { %s759_s19 = scalar_select %p631_p9, 1, 0 }
  0x11   : > { %p638_p11 = por %p83_p10, %p51_p3  ;;  %s103_s22 = sand.u32 1, %s552_s8  }
  0x12   : > { %s352_s23 = sshll.u32 %s103_s22, 3  ;;  %s365_s24 = sshll.u32 %s560_s10, 7 }
  0x13   : > { %s760_s21 = scalar_select %p638_p11, 1, 0 }
  0x14   : > { %s649_s27 = scalar_lea.hbm %s754_s0, %s365_s24  ;;  %s107_s28 = scalar_lea.vmem [#allocation2], %s352_s23 }
  0x15   : > { %s115_s29 = sshll.u32 %s107_s28, 4  ;;  %p655_p0 = pnand %p378_p13, %p621_p4  ;;  %s651_s29 = int_to_ptr.vmem [resolvable:$true] %s115_s29 }
  0x16   : > { %s660_s2 = scalar_lea.sflag [#allocation3], %s103_s22  ;;  %s452_s3 = scalar_lea.hbm %s649_s27, 128 }
  0x17   : > { %p453_p2 = scmp.ne.s32.totalorder %s649_s27, %s452_s3  ;;  %p454_p3 = pneg %p655_p0 }
  0x18   : > { %s457_s12 = scalar_lea.hbm %s754_s0, 256  ;;  %p458_p4 = scmp.lt.u32.totalorder %s649_s27, %s754_s0 }
  0x19   : > { %p455_p5 = pnand %p454_p3, %p453_p2  ;;  %p459_p7 = scmp.lt.u32.totalorder %s457_s12, %s452_s3 }
  0x1a   : > { %p461_p13 = scmp.lt.u32.totalorder %s452_s3, %s649_s27 }
  0x1b   : > { %p456_p6 = pneg %p455_p5  ;;  %p460_p10 = por %p459_p7, %p458_p4 }
  0x1d   : > { %p462_p12 = por %p461_p13, %p460_p10 }
  0x1f   : > { %p463_p1 = pnand %p462_p12, %p456_p6 }
  0x21   : > { %466 = shalt.err (!%p463_p1)
}
  0x22   : > { %s467_s16 = scalar_lea.vmem %s651_s29, 128  ;;  %s566_s17 = smov [#allocation2]  }
  0x23   : > { %p468_p2 = scmp.ne.s32.totalorder %s651_s29, %s467_s16  ;;  %s472_s22 = sshll.u32 %s566_s17, 4  ;;  %s473_s22 = int_to_ptr.vmem [resolvable:$false] %s472_s22 }
  0x24   : > { %s474_s23 = scalar_lea.vmem %s473_s22, 256  ;;  %p475_p9 = scmp.lt.s32.totalorder %s651_s29, %s473_s22 }
  0x25   : > { %p470_p5 = pnand %p468_p2, %p454_p3  ;;  %p476_p4 = scmp.lt.s32.totalorder %s474_s23, %s467_s16 }
  0x27   : > { %p471_p11 = pneg %p470_p5  ;;  %p477_p7 = por %p476_p4, %p475_p9 }
  0x29   : > { %p478_p10 = pnand %p477_p7, %p471_p11 }
  0x2b   : > { %481 = shalt.err (!%p478_p10)
}
  0x2c   : > { %s567_s24 = smov 32   ;;  %s568_s25 = smov 2  }
  0x2d   : > { %373 = dma.hbm_to_vmem [thread:$0]  (!%p655_p0), %s649_s27, 128, %s651_s29, %s660_s2, %s567_s24, %s567_s24, %s568_s25  }
  0x2e   : > { %p123_p12 = scmp.lt.s32.totalorder %s564_s11, 3  ;;  %p762_p1 = scmp.ge.s32.totalorder %s564_s11, 1 }
  0x30   : > { %p124_p3 = pnand %p762_p1, %p123_p12 }
  0x31   : > { %s692_s26 = sand.u32 (!%p124_p3), 1, %s548_s7  }
  0x32   : > { %127 = sbr.rel (%p124_p3) target bundleno = 144 (0x90), region = 24  ;;  %s356_s28 = sshll.u32 (!%p124_p3), %s692_s26, 3 }
  0x33   : > { %s130_s3 = scalar_lea.sflag (!%p124_p3), [#allocation3], %s692_s26  ;;  %s133_s4 = scalar_lea.vmem (!%p124_p3), [#allocation2], %s356_s28 }
  0x39   : > { %535 = dma.done.wait (%p627_p8), %s130_s3, 128  }
  0x3a   : > { %537 = vsyncadd (%p627_p8), %s130_s3, 4294967168  ;;  %v152_v0 = vld [vmem:[%s133_s4] sm:$0x3]  ;;  %v358_v1 = vld [vmem:[%s133_s4 + $0x2] sm:$0x3]  ;;  %s357_s18 = sshll.u32 %s692_s26, 1 }
  0x3b   : > { %v359_v2 = vld [vmem:[%s133_s4 + $0x4] sm:$0x3]  ;;  %v159_v3 = vmul.f32 -1.0, %v152_v0  ;;  %v160_v4 = vmul.f32 -0.6666667, %v152_v0  ;;  %v168_v13 = vmul.f32 -1.0, %v358_v1 }
  0x3c   : > { %v161_v5 = vmul.f32 0.33333334, %v358_v1  ;;  %v164_v6 = vmul.f32 -0.33333334, %v152_v0  ;;  %v165_v7 = vmul.f32 0.6666667, %v358_v1 }
  0x3d   : > { %v170_v10 = vmul.f32 -0.6666667, %v358_v1  ;;  %v171_v11 = vmul.f32 0.33333334, %v359_v2  ;;  %v174_v14 = vmul.f32 -0.33333334, %v358_v1 }
  0x3e   : > { %v162_v8 = vsub.f32 %v160_v4, %v161_v5  ;;  %v166_v9 = vsub.f32 %v164_v6, %v165_v7  ;;  %v175_v15 = vmul.f32 0.6666667, %v359_v2  ;;  %v360_v16 = vld [vmem:[%s133_s4 + $0x6] sm:$0x3]  ;;  %v180_v21 = vmul.f32 -0.6666667, %v359_v2 }
  0x3f   : > { %v172_v18 = vsub.f32 %v170_v10, %v171_v11  ;;  %v181_v22 = vmul.f32 0.33333334, %v360_v16  ;;  %v178_v24 = vmul.f32 -1.0, %v359_v2  ;;  %v184_v25 = vmul.f32 -0.33333334, %v359_v2  ;;  %s151_s27 = scalar_lea.vmem [#allocation5], %s357_s18 }
  0x40   : > { %v163_v12 = vmax.f32 %v159_v3, %v162_v8  ;;  %v176_v20 = vsub.f32 %v174_v14, %v175_v15  ;;  %v185_v26 = vmul.f32 0.6666667, %v360_v16  ;;  %v188_v32 = vmul.f32 -1.0, %v360_v16  ;;  %s267_s29 = sshll.u32 %s151_s27, 4  ;;  %s362_s30 = sshll.u32 %s556_s9, 5  ;;  %s702_s29 = int_to_ptr.vmem [resolvable:$true] %s267_s29 }
  0x41   : > { %v182_v28 = vsub.f32 %v180_v21, %v181_v22  ;;  %s707_s12 = scalar_lea.hbm %s755_s1, %s362_s30  ;;  %s253_s13 = scalar_lea.sflag [#allocation4], %s692_s26 }
  0x42   : > { %v167_v17 = vmax.f32 %v163_v12, %v166_v9  ;;  %v186_v30 = vsub.f32 %v184_v25, %v185_v26  ;;  %s482_s15 = scalar_lea.vmem %s702_s29, 32  ;;  %p763_p9 = scmp.ne.s32.totalorder %s759_s19, 0 }
  0x43   : > { %p483_p8 = scmp.ne.s32.totalorder %s702_s29, %s482_s15  ;;  %s569_s9 = smov [#allocation5]  }
  0x44   : > { %v169_v19 = vmax.f32 %v167_v17, %v168_v13  ;;  %s486_s16 = sshll.u32 %s569_s9, 4  ;;  %s487_s16 = int_to_ptr.vmem [resolvable:$false] %s486_s16 }
  0x45   : > { %p484_p11 = pnand %p483_p8, %p763_p9  ;;  %s488_s17 = scalar_lea.vmem %s487_s16, 64 }
  0x46   : > { %v173_v23 = vmax.f32 %v169_v19, %v172_v18  ;;  %p489_p6 = scmp.lt.s32.totalorder %s702_s29, %s487_s16  ;;  %p490_p13 = scmp.lt.s32.totalorder %s488_s17, %s482_s15 }
  0x47   : > { %p485_p0 = pneg %p484_p11 }
  0x48   : > { %v177_v27 = vmax.f32 %v173_v23, %v176_v20  ;;  %p491_p2 = por %p490_p13, %p489_p6 }
  0x4a   : > { %v179_v29 = vmax.f32 %v177_v27, %v178_v24  ;;  %p492_p5 = pnand %p491_p2, %p485_p0 }
  0x4c   : > { %v183_v31 = vmax.f32 %v179_v29, %v182_v28 }
  0x4e   : > { %v187_v33 = vmax.f32 %v183_v31, %v186_v30 }
  0x50   : > { %v189_v34 = vmax.f32 %v187_v33, %v188_v32 }
  0x52   : > { %v190_v35 = vsub.f32 %v159_v3, %v189_v34  ;;  %v194_v36 = vsub.f32 %v162_v8, %v189_v34  ;;  %v200_v37 = vsub.f32 %v166_v9, %v189_v34  ;;  %v206_v38 = vsub.f32 %v168_v13, %v189_v34 }
  0x53   : > { %v212_v39 = vsub.f32 %v172_v18, %v189_v34  ;;  %v218_v44 = vsub.f32 %v176_v20, %v189_v34  ;;  %v224_v46 = vsub.f32 %v178_v24, %v189_v34  ;;  %v230_v48 = vsub.f32 %v182_v28, %v189_v34 }
  0x54   : > { %v191_v40 = vmul.f32 1.442695, %v190_v35  ;;  %v195_v41 = vmul.f32 1.442695, %v194_v36  ;;  %v201_v42 = vmul.f32 1.442695, %v200_v37  ;;  %v242_v49 = vsub.f32 %v188_v32, %v189_v34 }
  0x55   : > { %v207_v43 = vmul.f32 1.442695, %v206_v38  ;;  %v213_v45 = vmul.f32 1.442695, %v212_v39  ;;  %v219_v47 = vmul.f32 1.442695, %v218_v44  ;;  %v236_v51 = vsub.f32 %v186_v30, %v189_v34 }
  0x56   : > { %430 = vpow2.f32 %v191_v40  ;;  %v225_v50 = vmul.f32 1.442695, %v224_v46  ;;  %v231_v52 = vmul.f32 1.442695, %v230_v48  ;;  %v243_v53 = vmul.f32 1.442695, %v242_v49 }
  0x57   : > { %432 = vpow2.f32 %v195_v41  ;;  %v237_v55 = vmul.f32 1.442695, %v236_v51 }
  0x58   : > { %434 = vpow2.f32 %v201_v42 }
  0x59   : > { %436 = vpow2.f32 %v207_v43 }
  0x5a   : > { %438 = vpow2.f32 %v213_v45 }
  0x5b   : > { %440 = vpow2.f32 %v219_v47 }
  0x5c   : > { %442 = vpow2.f32 %v225_v50 }
  0x5d   : > { %444 = vpow2.f32 %v231_v52 }
  0x5e   : > { %446 = vpow2.f32 %v243_v53 }
  0x5f   : > { %448 = vpow2.f32 %v237_v55 }
  0x60   : > { %v431_v54 = vpop.eup %430 }
  0x61   : > { %v433_v56 = vpop.eup %432  ;;  %v193_v57 = vmul.f32 2.0, %v431_v54 }
  0x62   : > { %v435_v58 = vpop.eup %434  ;;  %v198_v59 = vmul.f32 2.0, %v433_v56 }
  0x63   : > { %v437_v60 = vpop.eup %436  ;;  %v197_v61 = vadd.f32 %v433_v56, %v193_v57  ;;  %v204_v62 = vmul.f32 3.0, %v435_v58 }
  0x64   : > { %v199_v63 = vadd.f32 %v431_v54, %v198_v59  ;;  %v210_v0 = vmul.f32 4.0, %v437_v60  ;;  %v439_v1 = vpop.eup %438 }
  0x65   : > { %v203_v2 = vadd.f32 %v435_v58, %v197_v61  ;;  %v216_v4 = vmul.f32 5.0, %v439_v1  ;;  %v441_v5 = vpop.eup %440 }
  0x66   : > { %v205_v3 = vadd.f32 %v204_v62, %v199_v63  ;;  %v222_v8 = vmul.f32 6.0, %v441_v5  ;;  %v443_v10 = vpop.eup %442 }
  0x67   : > { %v209_v6 = vadd.f32 %v437_v60, %v203_v2  ;;  %v445_v12 = vpop.eup %444  ;;  %v228_v16 = vmul.f32 7.0, %v443_v10 }
  0x68   : > { %v211_v7 = vadd.f32 %v210_v0, %v205_v3  ;;  %v447_v14 = vpop.eup %446  ;;  %v234_v22 = vmul.f32 8.0, %v445_v12 }
  0x69   : > { %v215_v9 = vadd.f32 %v439_v1, %v209_v6  ;;  %v449_v18 = vpop.eup %448  ;;  %v245_v20 = vmul.f32 2.0, %v447_v14  ;;  %v247_v28 = vmul.f32 21.0, %v447_v14 }
  0x6a   : > { %v217_v11 = vadd.f32 %v216_v4, %v211_v7  ;;  %v240_v26 = vmul.f32 9.0, %v449_v18 }
  0x6b   : > { %v221_v13 = vadd.f32 %v441_v5, %v215_v9 }
  0x6c   : > { %v223_v15 = vadd.f32 %v222_v8, %v217_v11 }
  0x6d   : > { %v227_v17 = vadd.f32 %v443_v10, %v221_v13 }
  0x6e   : > { %v229_v21 = vadd.f32 %v228_v16, %v223_v15 }
  0x6f   : > { %v233_v19 = vadd.f32 %v445_v12, %v227_v17 }
  0x70   : > { %v235_v25 = vadd.f32 %v234_v22, %v229_v21 }
  0x71   : > { %v239_v23 = vadd.f32 %v449_v18, %v233_v19 }
  0x72   : > { %v241_v27 = vadd.f32 %v240_v26, %v235_v25 }
  0x73   : > { %v246_v24 = vadd.f32 %v245_v20, %v239_v23 }
  0x74   : > { %v248_v29 = vadd.f32 %v247_v28, %v241_v27 }
  0x75   : > { %450 = vrcp.f32 %v246_v24 }
  0x7f   : > { %v451_v30 = vpop.eup %450 }
  0x80   : > { %v250_v31 = vmul.f32 %v451_v30, %v248_v29 }
  0x82   : > { %251 = vst [vmem:[%s151_s27] sm:$0x3] %v250_v31 }
  0x83   : > { %495 = shalt.err (!%p492_p5)
}
  0x84   : > { %s496_s22 = scalar_lea.hbm %s707_s12, 32  ;;  %s500_s25 = scalar_lea.hbm %s755_s1, 64 }
  0x85   : > { %p497_p4 = scmp.ne.s32.totalorder %s707_s12, %s496_s22  ;;  %p501_p12 = scmp.lt.u32.totalorder %s707_s12, %s755_s1 }
  0x86   : > { %p502_p1 = scmp.lt.u32.totalorder %s500_s25, %s496_s22  ;;  %p504_p8 = scmp.lt.u32.totalorder %s496_s22, %s707_s12 }
  0x87   : > { %p498_p7 = pnand %p497_p4, %p763_p9 }
  0x88   : > { %p503_p3 = por %p502_p1, %p501_p12 }
  0x89   : > { %p499_p10 = pneg %p498_p7 }
  0x8a   : > { %p505_p11 = por %p504_p8, %p503_p3 }
  0x8c   : > { %p506_p0 = pnand %p505_p11, %p499_p10 }
  0x8e   : > { %509 = shalt.err (!%p506_p0)
}
  0x8f   : > { %368 = dma.vmem_to_hbm [thread:$0]  (%p763_p9), %s702_s29, 32, %s707_s12, %s253_s13  }
  0x90 PF: > { %s279_s3 = sand.u32 1, %s544_s6   ;;  %p764_p6 = scmp.ne.s32.totalorder %s760_s21, 0 }
  0x91   : > { %p765_p13 = scmp.ge.s32.totalorder %s564_s11, 2  ;;  %s280_s4 = scalar_lea.sflag [#allocation4], %s279_s3 }
  0x93   : > { %p375_p2 = pnand %p765_p13, %p764_p6 }
  0x95   : > { %539 = dma.done.wait (!%p375_p2), %s280_s4, 32  }
  0x96   : > { %541 = vsyncadd (!%p375_p2), %s280_s4, 4294967264  ;;  %s17_s11 = sadd.s32 1, %s564_s11   ;;  %s766_s6 = smov %s548_s7 }
  0x97   : > { %p14_p5 = scmp.ge.s32.totalorder %s17_s11, 4   ;;  %s767_s7 = smov %s552_s8 }
  0x98   : > { %s768_s8 = smov %s636_s20  ;;  %s769_s9 = smov %s560_s10 }
  0x99   : > { %s770_s10 = smov %s772_s14  ;;  %16 = sbr.rel (!%p14_p5) target bundleno = 6 (0x6), region = 72 }
  0xa0   :  { %285 = vsyncpa [#allocation3], 1 }
  0xa1   :  { %287 = vsyncpa [#allocation3 + $0x1], 1 }
  0xa2   :  { %288 = vsyncpa [#allocation4], 1 }
  0xa3   :  { %290 = vsyncpa [#allocation4 + $0x1], 1 }

</bundles_post_ra>
